<compile_context>
chip_gen: v7x
topology: tpu7x:2x2x1
jax: 0.10.0
libtpu: 0.0.40
codegen_flags: <defaults>
</compile_context>

<pallas_src>
import jax
import jax.numpy as jnp
from jax import lax
from jax.experimental import pallas as pl
from jax.experimental.pallas import tpu as pltpu

LANES = 128
TARGET_ROWS = 4096        # 2 MiB f32 block per input; 8 MiB double-buffered total
VARIANCE_FOCUS = 0.85


def _num_tc_splits():
    """2-way split only on v7x (2 TensorCores per chip); v5e/v6e are single-TC."""
    try:
        kind = jax.devices()[0].device_kind.lower()
    except Exception:
        return 1
    return 2 if ("v7" in kind or "7x" in kind) else 1


def _make_silog_kernel(rows, br, acc_sub, half):
    """rows: valid rows of the (rows, 128) slab; br: block rows; acc_sub:
    accumulator sublane count; half: inner grid extent per split. Static ints."""
    groups = br // acc_sub  # number of (acc_sub, 128) slabs per block

    def kernel(pred_ref, gt_ref, out_ref):
        c = pl.program_id(0)   # split (core) index
        i = pl.program_id(1)   # sequential block index within the split

        @pl.when(i == 0)
        def _():
            out_ref[...] = jnp.zeros_like(out_ref)

        gt = gt_ref[...].astype(jnp.float32)
        pred = pred_ref[...].astype(jnp.float32)

        blk = c * half + i                       # *unclamped* logical block id
        row0 = blk * br

        def accumulate(mask):
            pred_c = jnp.maximum(pred, jnp.float32(1e-6))
            # No "safe" selects before the logs: log(pred_c) is always finite,
            # and any NaN/-inf from log(gt <= 0 / boundary garbage) is discarded
            # by this select (select picks, it does not multiply).
            d = jnp.where(mask, jnp.log(pred_c) - jnp.log(gt), jnp.float32(0.0))
            m_f = mask.astype(jnp.float32)
            if groups > 1:
                # Sublane-major reshape + sum over axis 0 = whole-vreg VPU adds,
                # no cross-lane (XLU) reduction in the hot loop.
                d2p = jnp.sum((d * d).reshape(groups, acc_sub, LANES), axis=0)
                dp = jnp.sum(d.reshape(groups, acc_sub, LANES), axis=0)
                cp = jnp.sum(m_f.reshape(groups, acc_sub, LANES), axis=0)
            else:
                d2p, dp, cp = d * d, d, m_f
            out_ref[0, :, :] += d2p   # sum(d^2) partials
            out_ref[1, :, :] += dp    # sum(d)   partials
            out_ref[2, :, :] += cp    # count    partials

        # Interior blocks (fully inside the valid row range) skip the per-element
        # row mask entirely; only the tail block and clamped duplicate blocks of
        # the second split pay for the iota/compare.
        interior = row0 + br <= rows

        @pl.when(interior)
        def _():
            accumulate(gt > jnp.float32(0.001))

        @pl.when(jnp.logical_not(interior))
        def _():
            row_ids = lax.broadcasted_iota(jnp.int32, (br, LANES), 0) + row0
            accumulate((row_ids < rows) & (gt > jnp.float32(0.001)))

    return kernel


def silog_loss_variance(prediction, gt, variance_focus=VARIANCE_FOCUS):
    assert prediction.shape == gt.shape
    n = prediction.size

    # Inputs pass through in their native dtype (f32 or bf16); the f32 upcast
    # happens in-kernel after the DMA so bf16 callers get halved HBM traffic.
    pred_flat = prediction.reshape(-1)
    gt_flat = gt.reshape(-1)

    # Only pad when n is not lane-aligned (padding gt with 0 fails the mask).
    if n % LANES != 0:
        pad = LANES - (n % LANES)
        pred_flat = jnp.pad(pred_flat, (0, pad))
        gt_flat = jnp.pad(gt_flat, (0, pad))

    rows = pred_flat.shape[0] // LANES
    pred2d = pred_flat.reshape(rows, LANES)
    gt2d = gt_flat.reshape(rows, LANES)

    br = min(TARGET_ROWS, rows)                 # block rows (full array if small)
    acc_sub = 8 if br % 8 == 0 else br          # accumulator sublane count
    n_blocks = -(-rows // br)

    num_splits = _num_tc_splits()
    if n_blocks < num_splits:
        num_splits = 1                          # nothing to split
    half = -(-n_blocks // num_splits)           # blocks per split

    def in_map(c, i):
        # Clamp so the second split never requests a fully out-of-range block;
        # duplicated blocks are zeroed out by the in-kernel row mask.
        return (jnp.minimum(c * half + i, n_blocks - 1), 0)

    if num_splits > 1:
        # v7x: explicitly shard the leading axis across the 2 TensorCores.
        dims = (pltpu.CORE_PARALLEL, pltpu.ARBITRARY)
    else:
        dims = ("parallel", "arbitrary")

    out = pl.pallas_call(
        _make_silog_kernel(rows, br, acc_sub, half),
        out_shape=jax.ShapeDtypeStruct((num_splits * 3, acc_sub, LANES), jnp.float32),
        grid_spec=pltpu.PrefetchScalarGridSpec(
            num_scalar_prefetch=0,
            grid=(num_splits, half),
            in_specs=[
                pl.BlockSpec((br, LANES), in_map),
                pl.BlockSpec((br, LANES), in_map),
            ],
            out_specs=pl.BlockSpec((3, acc_sub, LANES), lambda c, i: (c, 0, 0)),
        ),
        compiler_params=pltpu.CompilerParams(
            dimension_semantics=dims,
            vmem_limit_bytes=32 * 1024 * 1024,
        ),
    )(pred2d, gt2d)

    parts = out.reshape(num_splits, 3, acc_sub, LANES)
    sums = jnp.sum(parts, axis=(0, 2, 3))
    sum_d2, sum_d, count = sums[0], sums[1], sums[2]
    # count == 0 -> NaN, matching PyTorch's degenerate masked-mean behavior.
    mean_d2 = sum_d2 / count
    mean_d = sum_d / count
    loss = mean_d2 - jnp.float32(variance_focus) * mean_d * mean_d
    return jnp.sqrt(loss) * jnp.float32(10.0)


def _reference(prediction, gt, variance_focus=VARIANCE_FOCUS):
    mask = gt > 0.001
    pred = jnp.maximum(prediction, 1e-6)
    d = jnp.where(mask, jnp.log(pred) - jnp.log(jnp.where(mask, gt, 1.0)), 0.0)
    cnt = jnp.sum(mask.astype(jnp.float32))
    mean_d2 = jnp.sum(d * d) / cnt
    mean_d = jnp.sum(d) / cnt
    return jnp.sqrt(mean_d2 - variance_focus * mean_d ** 2) * 10.0


if __name__ == "__main__":
    key = jax.random.PRNGKey(0)
    k1, k2 = jax.random.split(key)

    B, C, H, W = 2, 4, 16, 16  # NCHW, like the PyTorch module's inputs
    prediction = jax.random.uniform(k1, (B, C, H, W), jnp.float32,
                                    minval=0.0, maxval=10.0)
    # gt with some non-positive / sub-threshold entries so the mask (and the
    # "drop the safe selects" change) is actually exercised.
    gt = jax.random.uniform(k2, (B, C, H, W), jnp.float32,
                            minval=-1.0, maxval=10.0)

    out = silog_loss_variance(prediction, gt)
    out = jax.block_until_ready(out)

    ref = _reference(prediction, gt)
    assert jnp.allclose(out, ref, rtol=1e-5, atol=1e-5), (out, ref)
    print("KERNEL_OK")
</pallas_src>

<mosaic_0001>
module attributes {stable_mosaic.version = 11 : i64} {
  func.func @kernel(%arg0: i32, %arg1: i32, %arg2: memref<16x128xf32, #tpu.memory_space<vmem>>, %arg3: memref<16x128xf32, #tpu.memory_space<vmem>>, %arg4: memref<3x8x128xf32, #tpu.memory_space<vmem>>) attributes {dimension_semantics = [#tpu.dimension_semantics<parallel>, #tpu.dimension_semantics<arbitrary>], iteration_bounds = array<i64: 1, 1>, scalar_prefetch = 0 : i64, scratch_operands = 0 : i64, tpu.core_type = #tpu.core_type<tc>, window_params = [{transform_indices = @transform_0, window_bounds = array<i64: 16, 128>}, {transform_indices = @transform_1, window_bounds = array<i64: 16, 128>}, {transform_indices = @transform_2, window_bounds = array<i64: 3, 8, 128>}]} {
    %c0_i32 = arith.constant 0 : i32
    %0 = arith.cmpi eq, %arg1, %c0_i32 : i32
    %1 = arith.extui %0 : i1 to i32
    %c0_i32_0 = arith.constant 0 : i32
    %2 = arith.cmpi ne, %1, %c0_i32_0 : i32
    scf.if %2 {
      %cst = arith.constant 0.000000e+00 : f32
      %15 = vector.broadcast %cst : f32 to vector<3x8x128xf32>
      %c0_8 = arith.constant 0 : index
      %c0_9 = arith.constant 0 : index
      %c0_10 = arith.constant 0 : index
      %16 = vector.load %arg4[%c0_8, %c0_9, %c0_10] : memref<3x8x128xf32, #tpu.memory_space<vmem>>, vector<3x8x128xf32>
      tpu.vector_store %arg4[%c0_8, %c0_9, %c0_10], %15 {strides = array<i32>} : memref<3x8x128xf32, #tpu.memory_space<vmem>>, vector<3x8x128xf32>,
    } else {
    }
    %c0 = arith.constant 0 : index
    %c0_1 = arith.constant 0 : index
    %3 = vector.load %arg3[%c0, %c0_1] : memref<16x128xf32, #tpu.memory_space<vmem>>, vector<16x128xf32>
    %c0_2 = arith.constant 0 : index
    %c0_3 = arith.constant 0 : index
    %4 = vector.load %arg2[%c0_2, %c0_3] : memref<16x128xf32, #tpu.memory_space<vmem>>, vector<16x128xf32>
    %c1_i32 = arith.constant 1 : i32
    %5 = arith.muli %arg0, %c1_i32 : i32
    %6 = arith.addi %5, %arg1 : i32
    %c16_i32 = arith.constant 16 : i32
    %7 = arith.muli %6, %c16_i32 : i32
    %c16_i32_4 = arith.constant 16 : i32
    %8 = arith.addi %7, %c16_i32_4 : i32
    %c16_i32_5 = arith.constant 16 : i32
    %9 = arith.cmpi sle, %8, %c16_i32_5 : i32
    %10 = arith.extui %9 : i1 to i32
    %c0_i32_6 = arith.constant 0 : i32
    %11 = arith.cmpi ne, %10, %c0_i32_6 : i32
    scf.if %11 {
      %cst = arith.constant 1.000000e-03 : f32
      %15 = vector.broadcast %cst : f32 to vector<16x128xf32>
      %16 = arith.cmpf ogt, %3, %15 : vector<16x128xf32>
      %cst_8 = arith.constant 9.99999997E-7 : f32
      %17 = vector.broadcast %cst_8 : f32 to vector<16x128xf32>
      %18 = arith.maximumf %4, %17 : vector<16x128xf32>
      %19 = math.log %18 : vector<16x128xf32>
      %20 = math.log %3 : vector<16x128xf32>
      %21 = arith.subf %19, %20 : vector<16x128xf32>
      %cst_9 = arith.constant 0.000000e+00 : f32
      %22 = vector.broadcast %cst_9 : f32 to vector<16x128xf32>
      %23 = arith.select %16, %21, %22 : vector<16x128xi1>, vector<16x128xf32>
      %24 = arith.extui %16 : vector<16x128xi1> to vector<16x128xi32>
      %25 = arith.sitofp %24 : vector<16x128xi32> to vector<16x128xf32>
      %26 = arith.mulf %23, %23 : vector<16x128xf32>
      %27 = vector.shape_cast %26 : vector<16x128xf32> to vector<2x8x128xf32>
      %cst_10 = arith.constant dense<0.000000e+00> : vector<8x128xf32>
      %28 = vector.multi_reduction <add>, %27, %cst_10 [0] : vector<2x8x128xf32> to vector<8x128xf32>
      %29 = vector.shape_cast %23 : vector<16x128xf32> to vector<2x8x128xf32>
      %cst_11 = arith.constant dense<0.000000e+00> : vector<8x128xf32>
      %30 = vector.multi_reduction <add>, %29, %cst_11 [0] : vector<2x8x128xf32> to vector<8x128xf32>
      %31 = vector.shape_cast %25 : vector<16x128xf32> to vector<2x8x128xf32>
      %cst_12 = arith.constant dense<0.000000e+00> : vector<8x128xf32>
      %32 = vector.multi_reduction <add>, %31, %cst_12 [0] : vector<2x8x128xf32> to vector<8x128xf32>
      %c0_13 = arith.constant 0 : index
      %c0_14 = arith.constant 0 : index
      %c0_15 = arith.constant 0 : index
      %33 = vector.load %arg4[%c0_13, %c0_14, %c0_15] : memref<3x8x128xf32, #tpu.memory_space<vmem>>, vector<1x8x128xf32>
      %34 = vector.shape_cast %33 : vector<1x8x128xf32> to vector<8x128xf32>
      %35 = arith.addf %34, %28 : vector<8x128xf32>
      %c0_16 = arith.constant 0 : index
      %c0_17 = arith.constant 0 : index
      %c0_18 = arith.constant 0 : index
      %36 = vector.load %arg4[%c0_16, %c0_17, %c0_18] : memref<3x8x128xf32, #tpu.memory_space<vmem>>, vector<1x8x128xf32>
      %37 = vector.shape_cast %36 : vector<1x8x128xf32> to vector<8x128xf32>
      %38 = vector.shape_cast %35 : vector<8x128xf32> to vector<1x8x128xf32>
      tpu.vector_store %arg4[%c0_16, %c0_17, %c0_18], %38 {strides = array<i32>} : memref<3x8x128xf32, #tpu.memory_space<vmem>>, vector<1x8x128xf32>,
      %c1 = arith.constant 1 : index
      %c0_19 = arith.constant 0 : index
      %c0_20 = arith.constant 0 : index
      %39 = vector.load %arg4[%c1, %c0_19, %c0_20] : memref<3x8x128xf32, #tpu.memory_space<vmem>>, vector<1x8x128xf32>
      %40 = vector.shape_cast %39 : vector<1x8x128xf32> to vector<8x128xf32>
      %41 = arith.addf %40, %30 : vector<8x128xf32>
      %c1_21 = arith.constant 1 : index
      %c0_22 = arith.constant 0 : index
      %c0_23 = arith.constant 0 : index
      %42 = vector.load %arg4[%c1_21, %c0_22, %c0_23] : memref<3x8x128xf32, #tpu.memory_space<vmem>>, vector<1x8x128xf32>
      %43 = vector.shape_cast %42 : vector<1x8x128xf32> to vector<8x128xf32>
      %44 = vector.shape_cast %41 : vector<8x128xf32> to vector<1x8x128xf32>
      tpu.vector_store %arg4[%c1_21, %c0_22, %c0_23], %44 {strides = array<i32>} : memref<3x8x128xf32, #tpu.memory_space<vmem>>, vector<1x8x128xf32>,
      %c2 = arith.constant 2 : index
      %c0_24 = arith.constant 0 : index
      %c0_25 = arith.constant 0 : index
      %45 = vector.load %arg4[%c2, %c0_24, %c0_25] : memref<3x8x128xf32, #tpu.memory_space<vmem>>, vector<1x8x128xf32>
      %46 = vector.shape_cast %45 : vector<1x8x128xf32> to vector<8x128xf32>
      %47 = arith.addf %46, %32 : vector<8x128xf32>
      %c2_26 = arith.constant 2 : index
      %c0_27 = arith.constant 0 : index
      %c0_28 = arith.constant 0 : index
      %48 = vector.load %arg4[%c2_26, %c0_27, %c0_28] : memref<3x8x128xf32, #tpu.memory_space<vmem>>, vector<1x8x128xf32>
      %49 = vector.shape_cast %48 : vector<1x8x128xf32> to vector<8x128xf32>
      %50 = vector.shape_cast %47 : vector<8x128xf32> to vector<1x8x128xf32>
      tpu.vector_store %arg4[%c2_26, %c0_27, %c0_28], %50 {strides = array<i32>} : memref<3x8x128xf32, #tpu.memory_space<vmem>>, vector<1x8x128xf32>,
    } else {
    }
    %true = arith.constant true
    %12 = arith.xori %9, %true : i1
    %13 = arith.extui %12 : i1 to i32
    %c0_i32_7 = arith.constant 0 : i32
    %14 = arith.cmpi ne, %13, %c0_i32_7 : i32
    scf.if %14 {
      %15 = tpu.iota {dimensions = array<i32: 0>} : vector<16x128xi32>
      %16 = vector.broadcast %7 : i32 to vector<16x128xi32>
      %17 = arith.addi %15, %16 : vector<16x128xi32>
      %c16_i32_8 = arith.constant 16 : i32
      %18 = vector.broadcast %c16_i32_8 : i32 to vector<16x128xi32>
      %19 = arith.cmpi slt, %17, %18 : vector<16x128xi32>
      %cst = arith.constant 1.000000e-03 : f32
      %20 = vector.broadcast %cst : f32 to vector<16x128xf32>
      %21 = arith.cmpf ogt, %3, %20 : vector<16x128xf32>
      %22 = arith.andi %19, %21 : vector<16x128xi1>
      %cst_9 = arith.constant 9.99999997E-7 : f32
      %23 = vector.broadcast %cst_9 : f32 to vector<16x128xf32>
      %24 = arith.maximumf %4, %23 : vector<16x128xf32>
      %25 = math.log %24 : vector<16x128xf32>
      %26 = math.log %3 : vector<16x128xf32>
      %27 = arith.subf %25, %26 : vector<16x128xf32>
      %cst_10 = arith.constant 0.000000e+00 : f32
      %28 = vector.broadcast %cst_10 : f32 to vector<16x128xf32>
      %29 = arith.select %22, %27, %28 : vector<16x128xi1>, vector<16x128xf32>
      %30 = arith.extui %22 : vector<16x128xi1> to vector<16x128xi32>
      %31 = arith.sitofp %30 : vector<16x128xi32> to vector<16x128xf32>
      %32 = arith.mulf %29, %29 : vector<16x128xf32>
      %33 = vector.shape_cast %32 : vector<16x128xf32> to vector<2x8x128xf32>
      %cst_11 = arith.constant dense<0.000000e+00> : vector<8x128xf32>
      %34 = vector.multi_reduction <add>, %33, %cst_11 [0] : vector<2x8x128xf32> to vector<8x128xf32>
      %35 = vector.shape_cast %29 : vector<16x128xf32> to vector<2x8x128xf32>
      %cst_12 = arith.constant dense<0.000000e+00> : vector<8x128xf32>
      %36 = vector.multi_reduction <add>, %35, %cst_12 [0] : vector<2x8x128xf32> to vector<8x128xf32>
      %37 = vector.shape_cast %31 : vector<16x128xf32> to vector<2x8x128xf32>
      %cst_13 = arith.constant dense<0.000000e+00> : vector<8x128xf32>
      %38 = vector.multi_reduction <add>, %37, %cst_13 [0] : vector<2x8x128xf32> to vector<8x128xf32>
      %c0_14 = arith.constant 0 : index
      %c0_15 = arith.constant 0 : index
      %c0_16 = arith.constant 0 : index
      %39 = vector.load %arg4[%c0_14, %c0_15, %c0_16] : memref<3x8x128xf32, #tpu.memory_space<vmem>>, vector<1x8x128xf32>
      %40 = vector.shape_cast %39 : vector<1x8x128xf32> to vector<8x128xf32>
      %41 = arith.addf %40, %34 : vector<8x128xf32>
      %c0_17 = arith.constant 0 : index
      %c0_18 = arith.constant 0 : index
      %c0_19 = arith.constant 0 : index
      %42 = vector.load %arg4[%c0_17, %c0_18, %c0_19] : memref<3x8x128xf32, #tpu.memory_space<vmem>>, vector<1x8x128xf32>
      %43 = vector.shape_cast %42 : vector<1x8x128xf32> to vector<8x128xf32>
      %44 = vector.shape_cast %41 : vector<8x128xf32> to vector<1x8x128xf32>
      tpu.vector_store %arg4[%c0_17, %c0_18, %c0_19], %44 {strides = array<i32>} : memref<3x8x128xf32, #tpu.memory_space<vmem>>, vector<1x8x128xf32>,
      %c1 = arith.constant 1 : index
      %c0_20 = arith.constant 0 : index
      %c0_21 = arith.constant 0 : index
      %45 = vector.load %arg4[%c1, %c0_20, %c0_21] : memref<3x8x128xf32, #tpu.memory_space<vmem>>, vector<1x8x128xf32>
      %46 = vector.shape_cast %45 : vector<1x8x128xf32> to vector<8x128xf32>
      %47 = arith.addf %46, %36 : vector<8x128xf32>
      %c1_22 = arith.constant 1 : index
      %c0_23 = arith.constant 0 : index
      %c0_24 = arith.constant 0 : index
      %48 = vector.load %arg4[%c1_22, %c0_23, %c0_24] : memref<3x8x128xf32, #tpu.memory_space<vmem>>, vector<1x8x128xf32>
      %49 = vector.shape_cast %48 : vector<1x8x128xf32> to vector<8x128xf32>
      %50 = vector.shape_cast %47 : vector<8x128xf32> to vector<1x8x128xf32>
      tpu.vector_store %arg4[%c1_22, %c0_23, %c0_24], %50 {strides = array<i32>} : memref<3x8x128xf32, #tpu.memory_space<vmem>>, vector<1x8x128xf32>,
      %c2 = arith.constant 2 : index
      %c0_25 = arith.constant 0 : index
      %c0_26 = arith.constant 0 : index
      %51 = vector.load %arg4[%c2, %c0_25, %c0_26] : memref<3x8x128xf32, #tpu.memory_space<vmem>>, vector<1x8x128xf32>
      %52 = vector.shape_cast %51 : vector<1x8x128xf32> to vector<8x128xf32>
      %53 = arith.addf %52, %38 : vector<8x128xf32>
      %c2_27 = arith.constant 2 : index
      %c0_28 = arith.constant 0 : index
      %c0_29 = arith.constant 0 : index
      %54 = vector.load %arg4[%c2_27, %c0_28, %c0_29] : memref<3x8x128xf32, #tpu.memory_space<vmem>>, vector<1x8x128xf32>
      %55 = vector.shape_cast %54 : vector<1x8x128xf32> to vector<8x128xf32>
      %56 = vector.shape_cast %53 : vector<8x128xf32> to vector<1x8x128xf32>
      tpu.vector_store %arg4[%c2_27, %c0_28, %c0_29], %56 {strides = array<i32>} : memref<3x8x128xf32, #tpu.memory_space<vmem>>, vector<1x8x128xf32>,
    } else {
    }
    return
  }
  func.func @transform_0(%arg0: i32, %arg1: i32) -> (i32, i32) {
    %c1_i32 = arith.constant 1 : i32
    %0 = arith.muli %arg0, %c1_i32 : i32
    %1 = arith.addi %0, %arg1 : i32
    %c0_i32 = arith.constant 0 : i32
    %2 = arith.minsi %1, %c0_i32 : i32
    %c0_i32_0 = arith.constant 0 : i32
    %c0_i32_1 = arith.constant 0 : i32
    return %2, %c0_i32_0 : i32, i32
  }
  func.func @transform_1(%arg0: i32, %arg1: i32) -> (i32, i32) {
    %c1_i32 = arith.constant 1 : i32
    %0 = arith.muli %arg0, %c1_i32 : i32
    %1 = arith.addi %0, %arg1 : i32
    %c0_i32 = arith.constant 0 : i32
    %2 = arith.minsi %1, %c0_i32 : i32
    %c0_i32_0 = arith.constant 0 : i32
    %c0_i32_1 = arith.constant 0 : i32
    return %2, %c0_i32_0 : i32, i32
  }
  func.func @transform_2(%arg0: i32, %arg1: i32) -> (i32, i32, i32) {
    %c0_i32 = arith.constant 0 : i32
    %c0_i32_0 = arith.constant 0 : i32
    %c0_i32_1 = arith.constant 0 : i32
    return %arg0, %c0_i32, %c0_i32_0 : i32, i32, i32
  }
}

</mosaic_0001>

<bundles_post_ra>
// kernel: tpu_custom_call.1
= control target key start
LH: loop header
LB: loop body
LE: loop exit
PB: predicated region body
PF: predicated region fallthrough
CT: control target
= control target key end

     0   :  { %7 = vsyncpa [#allocation3], 0  ;;  %s346_s0 = inlined_call_operand.hbm [shape: f32[16,128], index: 0, kind: input, shape index: {}]   ;;  %s347_s1 = inlined_call_operand.hbm [shape: f32[16,128], index: 1, kind: input, shape index: {}]   ;;  %s348_s2 = inlined_call_operand.hbm [shape: f32[3,8,128], index: 2, kind: output, shape index: {}]  }
   0x1   :  { %8 = vsyncpa [#allocation6], 0 }
   0x2   :  { %9 = vsyncpa [#allocation4], 0  ;;  %s276_s9 = smov [#allocation2]   ;;  %s204_s13 = scalar_lea.hbm %s346_s0, 256 }
   0x3   :  { %s21_s10 = sshll.u32 %s276_s9, 4  ;;  %p205_p0 = scmp.ne.s32.totalorder %s346_s0, %s204_s13  ;;  %s22_s10 = int_to_ptr.vmem [resolvable:$true] %s21_s10 }
   0x4   :  { %p208_p1 = scmp.lt.u32.totalorder %s204_s13, %s346_s0 }
   0x6   :  { %p210_p2 = pnand %p208_p1, %p205_p0 }
   0x8   :  { %213 = shalt.err (!%p210_p2)
}
   0x9   :  { %s214_s18 = scalar_lea.vmem %s22_s10, 256  ;;  %p219_p4 = scmp.lt.s32.totalorder %s22_s10, %s22_s10 }
   0xa   :  { %p215_p3 = scmp.ne.s32.totalorder %s22_s10, %s214_s18  ;;  %p220_p5 = scmp.lt.s32.totalorder %s214_s18, %s214_s18 }
   0xc   :  { %p221_p6 = por %p220_p5, %p219_p4 }
   0xe   :  { %p222_p7 = pnand %p221_p6, %p215_p3 }
  0x10   :  { %225 = shalt.err (!%p222_p7)
}
  0x11   :  { %s277_s19 = smov 128   ;;  %s278_s20 = smov 8  }
  0x12   :  { %27 = dma.hbm_to_vmem [thread:$0]  %s346_s0, 256, %s22_s10, [#allocation3], %s277_s19, %s277_s19, %s278_s20  }
  0x13   :  { %s279_s23 = smov [#allocation5]   ;;  %s226_s27 = scalar_lea.hbm %s347_s1, 256 }
  0x14   :  { %s39_s24 = sshll.u32 %s279_s23, 4  ;;  %p227_p8 = scmp.ne.s32.totalorder %s347_s1, %s226_s27  ;;  %s40_s24 = int_to_ptr.vmem [resolvable:$true] %s39_s24 }
  0x15   :  { %p230_p9 = scmp.lt.u32.totalorder %s226_s27, %s347_s1 }
  0x17   :  { %p232_p10 = pnand %p230_p9, %p227_p8 }
  0x19   :  { %235 = shalt.err (!%p232_p10)
}
  0x1a   :  { %s236_s4 = scalar_lea.vmem %s40_s24, 256  ;;  %p241_p12 = scmp.lt.s32.totalorder %s40_s24, %s40_s24 }
  0x1b   :  { %p237_p11 = scmp.ne.s32.totalorder %s40_s24, %s236_s4  ;;  %p242_p13 = scmp.lt.s32.totalorder %s236_s4, %s236_s4 }
  0x1d   :  { %p243_p0 = por %p242_p13, %p241_p12 }
  0x1f   :  { %p244_p1 = pnand %p243_p0, %p237_p11 }
  0x21   :  { %247 = shalt.err (!%p244_p1)
}
  0x22   :  { %45 = dma.hbm_to_vmem [thread:$0]  %s347_s1, 256, %s40_s24, [#allocation6], %s277_s19, %s277_s19, %s278_s20  }
  0x23   :  { %270 = dma.done.wait [#allocation3], 256  }
  0x24   :  { %271 = vsyncadd [#allocation3], 4294967040 }
  0x25   :  { %272 = dma.done.wait [#allocation6], 256  }
  0x26   :  { %273 = vsyncadd [#allocation6], 4294967040  ;;  %v67_v0 = vld [vmem:[#allocation5] sm:$0xff]  ;;  %v68_v1 = vld [vmem:[#allocation5 + $0x8] sm:$0xff]  ;;  %v280_v6 = vmov 0.0   ;;  %s281_s1 = smov [#allocation7]  }
  0x27   :  { %v69_v2 = vld [vmem:[#allocation2] sm:$0xff]  ;;  %v70_v3 = vld [vmem:[#allocation2 + $0x8] sm:$0xff]  ;;  %vm78_vm0 = vcmp.gt.f32.partialorder %v67_v0, 0.001  ;;  %vm79_vm1 = vcmp.gt.f32.partialorder %v68_v1, 0.001  ;;  %196 = vlog2.f32 %v67_v0 }
  0x28   :  { %v80_v4 = vmax.f32 %v69_v2, 1e-06  ;;  %v81_v5 = vmax.f32 %v70_v3, 1e-06  ;;  %198 = vlog2.f32 %v68_v1  ;;  %v186_v7 = vsel %vm78_vm0, 1.0, %v280_v6  ;;  %s169_s6 = sshll.u32 %s281_s1, 4  ;;  %s170_s6 = int_to_ptr.vmem [resolvable:$true] %s169_s6 }
  0x29   :  { %v187_v8 = vsel %vm79_vm1, 1.0, %v280_v6  ;;  %s248_s7 = scalar_lea.vmem %s170_s6, 384  ;;  %p253_p3 = scmp.lt.s32.totalorder %s170_s6, %s170_s6 }
  0x2a   :  { %200 = vlog2.f32 %v80_v4  ;;  %v102_v9 = vadd.f32 %v187_v8, %v186_v7  ;;  %p249_p2 = scmp.ne.s32.totalorder %s170_s6, %s248_s7  ;;  %p254_p4 = scmp.lt.s32.totalorder %s248_s7, %s248_s7 }
  0x2b   :  { %202 = vlog2.f32 %v81_v5 }
  0x2c   :  { %113 = vst [vmem:[#allocation7 + $0x10] sm:$0xff] %v102_v9  ;;  %p255_p5 = por %p254_p4, %p253_p3 }
  0x2e   :  { %p256_p6 = pnand %p255_p5, %p249_p2 }
  0x31   :  { %v197_v10 = vpop.eup %196 }
  0x32   :  { %v199_v11 = vpop.eup %198  ;;  %v87_v12 = vmul.f32 0.6931472, %v197_v10 }
  0x33   :  { %v89_v14 = vmul.f32 0.6931472, %v199_v11 }
  0x34   :  { %v201_v13 = vpop.eup %200 }
  0x35   :  { %v203_v15 = vpop.eup %202  ;;  %v83_v16 = vmul.f32 0.6931472, %v201_v13 }
  0x36   :  { %v85_v17 = vmul.f32 0.6931472, %v203_v15 }
  0x37   :  { %v90_v18 = vsub.f32 %v83_v16, %v87_v12 }
  0x38   :  { %v91_v19 = vsub.f32 %v85_v17, %v89_v14 }
  0x39   :  { %v92_v20 = vsel %vm78_vm0, %v90_v18, 0.0 }
  0x3a   :  { %v93_v21 = vsel %vm79_vm1, %v91_v19, 0.0  ;;  %v98_v22 = vmul.f32 %v92_v20, %v92_v20 }
  0x3b   :  { %v99_v23 = vmul.f32 %v93_v21, %v93_v21  ;;  %v101_v24 = vadd.f32 %v93_v21, %v92_v20 }
  0x3d   :  { %v100_v25 = vadd.f32 %v99_v23, %v98_v22  ;;  %109 = vst [vmem:[#allocation7 + $0x8] sm:$0xff] %v101_v24 }
  0x3f   :  { %105 = vst [vmem:[#allocation7] sm:$0xff] %v100_v25 }
  0x40   :  { %259 = shalt.err (!%p256_p6)
}
  0x41   :  { %s260_s10 = scalar_lea.hbm %s348_s2, 384 }
  0x42   :  { %p261_p7 = scmp.ne.s32.totalorder %s348_s2, %s260_s10  ;;  %p264_p8 = scmp.lt.u32.totalorder %s260_s10, %s348_s2 }
  0x44   :  { %p266_p9 = pnand %p264_p8, %p261_p7 }
  0x46   :  { %269 = shalt.err (!%p266_p9)
}
  0x47   :  { %175 = dma.vmem_to_hbm [thread:$0]  %s170_s6, 384, %s348_s2, [#allocation4], %s277_s19, %s277_s19, %s278_s20  }
  0x48   :  { %274 = dma.done.wait [#allocation4], 384  }
  0x49   :  { %275 = vsyncadd [#allocation4], 4294966912 }
  0x4a   :  { %179 = vsyncpa [#allocation3], 1 }
  0x4b   :  { %180 = vsyncpa [#allocation6], 1 }
  0x4c   :  { %181 = vsyncpa [#allocation4], 1 }

</bundles_post_ra>
